<compile_context>
chip_gen: v7x
topology: tpu7x:2x2x1
jax: 0.10.0
libtpu: 0.0.40
codegen_flags: <defaults>
</compile_context>

<pallas_src>
import jax
import jax.numpy as jnp
from jax.experimental import pallas as pl
from jax.experimental.pallas import tpu as pltpu

BN_EPS = 1e-5


def resblock_kernel(x_ref, w_ref, b_ref, o_ref):
    """Fused ResBlock forward (BN already folded into W / b).

    x_ref : (bm, N)    f32 input tile  (batch tile x neurons)
    w_ref : (4, N, N)  bf16 folded weights, (in, out) layout
    b_ref : (4, 1, N)  f32 folded biases
    o_ref : (bm, N)    f32 output tile
    """

    def basic_block(h, i):
        # Linear + folded BN: (h @ W'[i]) + b'[i]; bf16 MXU inputs, f32 accumulate.
        y = jnp.dot(h.astype(jnp.bfloat16), w_ref[i],
                    preferred_element_type=jnp.float32)
        y = y + b_ref[i]
        # Activation (ReLU). Dropout is identity in eval mode.
        return jnp.maximum(y, 0.0)

    x = x_ref[...].astype(jnp.float32)
    residual = x
    h = basic_block(x, 0)
    h = basic_block(h, 1) + residual
    residual = h
    h = basic_block(h, 2)
    h = basic_block(h, 3) + residual
    o_ref[...] = h.astype(o_ref.dtype)


def resblock_forward(x, W, b, gamma, beta, mean, var, *, block_m=128):
    """x: (B, N); W: (4, N_out, N_in) PyTorch layout; gamma/beta/mean/var: (4, N)."""
    B, N = x.shape
    assert N % 128 == 0, "neurons should be a multiple of 128 for lane-dense tiles"

    # --- One-time (inference) BN fold into the linear weights/bias ---
    # y = ((x @ W.T + b) - mean) * gamma / sqrt(var+eps) + beta
    #   =  x @ W' + b'   with  W' = W.T * scale (per output column),
    #                          b' = (b - mean) * scale + beta
    scale = gamma * jax.lax.rsqrt(var + BN_EPS)                   # (4, N)
    Wt = jnp.transpose(W, (0, 2, 1))                              # (4, in, out)
    W_fold = (Wt * scale[:, None, :]).astype(jnp.bfloat16)        # (4, N, N) bf16
    b_fold = ((b - mean) * scale + beta).astype(jnp.float32)      # (4, N)
    b_fold = b_fold.reshape(4, 1, N)

    # Pick the largest batch tile that divides B (keeps the demo wrapper simple
    # while still exercising a multi-step pipelined grid when B > block_m).
    bm = min(block_m, B)
    while B % bm != 0:
        bm //= 2
    grid = (B // bm,)

    flops = 2 * 4 * B * N * N
    bytes_accessed = int(x.size * 4            # x in (f32)
                         + W_fold.size * 2     # folded weights (bf16)
                         + b_fold.size * 4     # folded bias (f32)
                         + B * N * 4)          # out (f32)

    return pl.pallas_call(
        resblock_kernel,
        out_shape=jax.ShapeDtypeStruct((B, N), x.dtype),
        grid=grid,
        in_specs=[
            # batch-tiled activations: double-buffered / pipelined across grid steps
            pl.BlockSpec((bm, N), lambda i: (i, 0)),
            # constant block index -> weights/bias stay VMEM-resident (no re-DMA).
            # For large N, tile/stream these instead (v7x has only 64 MiB VMEM).
            pl.BlockSpec((4, N, N), lambda i: (0, 0, 0)),
            pl.BlockSpec((4, 1, N), lambda i: (0, 0, 0)),
        ],
        out_specs=pl.BlockSpec((bm, N), lambda i: (i, 0)),
        compiler_params=pltpu.CompilerParams(
            dimension_semantics=("parallel",),  # batch tiles shard across v7x's 2 TCs
        ),
        cost_estimate=pl.CostEstimate(
            flops=flops, transcendentals=0, bytes_accessed=bytes_accessed),
    )(x, W_fold, b_fold)


def resblock_reference(x, W, b, gamma, beta, mean, var):
    """Pure-JAX f32 reference mirroring the PyTorch forward (eval mode)."""
    def bb(h, i):
        y = h @ W[i].T + b[i]
        y = (y - mean[i]) * jax.lax.rsqrt(var[i] + BN_EPS) * gamma[i] + beta[i]
        return jnp.maximum(y, 0.0)

    residual = x
    h = bb(x, 0)
    h = bb(h, 1) + residual
    residual = h
    h = bb(h, 2)
    h = bb(h, 3) + residual
    return h


if __name__ == "__main__":
    # batch=256 tiled into two (128, 128) "parallel" grid steps; neurons=128.
    B, N = 256, 128

    key = jax.random.PRNGKey(0)
    kx, kw, kb, kg, kbeta, kmu, kvar = jax.random.split(key, 7)

    x = jax.random.normal(kx, (B, N), dtype=jnp.float32)

    # Deterministic synthetic parameters (4 BasicBlocks).
    bound = 1.0 / jnp.sqrt(jnp.float32(N))
    W = jax.random.uniform(kw, (4, N, N), minval=-bound, maxval=bound, dtype=jnp.float32)
    b = jax.random.uniform(kb, (4, N), minval=-bound, maxval=bound, dtype=jnp.float32)
    gamma = 1.0 + 0.1 * jax.random.normal(kg, (4, N), dtype=jnp.float32)
    beta = 0.1 * jax.random.normal(kbeta, (4, N), dtype=jnp.float32)
    mean = 0.1 * jax.random.normal(kmu, (4, N), dtype=jnp.float32)
    var = jnp.abs(1.0 + 0.1 * jax.random.normal(kvar, (4, N), dtype=jnp.float32))

    out = resblock_forward(x, W, b, gamma, beta, mean, var)
    out = jax.block_until_ready(out)

    ref = resblock_reference(x, W, b, gamma, beta, mean, var)
    assert out.shape == (B, N)
    # bf16 matmul inputs (f32 accumulate) vs the pure-f32 reference -> loose tol.
    max_err = float(jnp.max(jnp.abs(out - ref)))
    assert jnp.allclose(out, ref, atol=3e-2, rtol=3e-2), (
        f"mismatch vs JAX reference, max abs err = {max_err}")

    print("KERNEL_OK")
</pallas_src>

<mosaic_0001>
module attributes {stable_mosaic.version = 11 : i64} {
  func.func @resblock_kernel(%arg0: i32, %arg1: memref<128x128xf32, #tpu.memory_space<vmem>>, %arg2: memref<4x128x128xbf16, #tpu.memory_space<vmem>>, %arg3: memref<4x1x128xf32, #tpu.memory_space<vmem>>, %arg4: memref<128x128xf32, #tpu.memory_space<vmem>>) attributes {dimension_semantics = [#tpu.dimension_semantics<parallel>], iteration_bounds = array<i64: 2>, scalar_prefetch = 0 : i64, scratch_operands = 0 : i64, tpu.core_type = #tpu.core_type<tc>, window_params = [{transform_indices = @transform_0, window_bounds = array<i64: 128, 128>}, {pipeline_mode = #tpu.pipeline_mode<synchronous>, transform_indices = @transform_1, window_bounds = array<i64: 4, 128, 128>}, {pipeline_mode = #tpu.pipeline_mode<synchronous>, transform_indices = @transform_2, window_bounds = array<i64: 4, 1, 128>}, {transform_indices = @transform_3, window_bounds = array<i64: 128, 128>}]} {
    %c0 = arith.constant 0 : index
    %c0_0 = arith.constant 0 : index
    %0 = vector.load %arg1[%c0, %c0_0] : memref<128x128xf32, #tpu.memory_space<vmem>>, vector<128x128xf32>
    %1 = arith.truncf %0 : vector<128x128xf32> to vector<128x128xbf16>
    %c0_1 = arith.constant 0 : index
    %c0_2 = arith.constant 0 : index
    %c0_3 = arith.constant 0 : index
    %2 = vector.load %arg2[%c0_1, %c0_2, %c0_3] : memref<4x128x128xbf16, #tpu.memory_space<vmem>>, vector<1x128x128xbf16>
    %3 = vector.shape_cast %2 : vector<1x128x128xbf16> to vector<128x128xbf16>
    %cst = arith.constant dense<0.000000e+00> : vector<128x128xf32>
    %4 = tpu.matmul %1, %3, %cst {dimension_numbers = #tpu.dot_dimension_numbers<[1], [0], [0], [1], [0, 0, 1, 1], [], []>} : vector<128x128xbf16>, vector<128x128xbf16>, vector<128x128xf32> -> vector<128x128xf32>
    %c0_4 = arith.constant 0 : index
    %c0_5 = arith.constant 0 : index
    %c0_6 = arith.constant 0 : index
    %5 = vector.load %arg3[%c0_4, %c0_5, %c0_6] : memref<4x1x128xf32, #tpu.memory_space<vmem>>, vector<1x1x128xf32>
    %6 = vector.shape_cast %5 : vector<1x1x128xf32> to vector<1x128xf32>
    %7 = vector.broadcast %6 : vector<1x128xf32> to vector<128x128xf32>
    %8 = arith.addf %4, %7 : vector<128x128xf32>
    %cst_7 = arith.constant 0.000000e+00 : f32
    %9 = vector.broadcast %cst_7 : f32 to vector<128x128xf32>
    %10 = arith.maximumf %8, %9 : vector<128x128xf32>
    %11 = arith.truncf %10 : vector<128x128xf32> to vector<128x128xbf16>
    %c1 = arith.constant 1 : index
    %c0_8 = arith.constant 0 : index
    %c0_9 = arith.constant 0 : index
    %12 = vector.load %arg2[%c1, %c0_8, %c0_9] : memref<4x128x128xbf16, #tpu.memory_space<vmem>>, vector<1x128x128xbf16>
    %13 = vector.shape_cast %12 : vector<1x128x128xbf16> to vector<128x128xbf16>
    %cst_10 = arith.constant dense<0.000000e+00> : vector<128x128xf32>
    %14 = tpu.matmul %11, %13, %cst_10 {dimension_numbers = #tpu.dot_dimension_numbers<[1], [0], [0], [1], [0, 0, 1, 1], [], []>} : vector<128x128xbf16>, vector<128x128xbf16>, vector<128x128xf32> -> vector<128x128xf32>
    %c1_11 = arith.constant 1 : index
    %c0_12 = arith.constant 0 : index
    %c0_13 = arith.constant 0 : index
    %15 = vector.load %arg3[%c1_11, %c0_12, %c0_13] : memref<4x1x128xf32, #tpu.memory_space<vmem>>, vector<1x1x128xf32>
    %16 = vector.shape_cast %15 : vector<1x1x128xf32> to vector<1x128xf32>
    %17 = vector.broadcast %16 : vector<1x128xf32> to vector<128x128xf32>
    %18 = arith.addf %14, %17 : vector<128x128xf32>
    %cst_14 = arith.constant 0.000000e+00 : f32
    %19 = vector.broadcast %cst_14 : f32 to vector<128x128xf32>
    %20 = arith.maximumf %18, %19 : vector<128x128xf32>
    %21 = arith.addf %20, %0 : vector<128x128xf32>
    %22 = arith.truncf %21 : vector<128x128xf32> to vector<128x128xbf16>
    %c2 = arith.constant 2 : index
    %c0_15 = arith.constant 0 : index
    %c0_16 = arith.constant 0 : index
    %23 = vector.load %arg2[%c2, %c0_15, %c0_16] : memref<4x128x128xbf16, #tpu.memory_space<vmem>>, vector<1x128x128xbf16>
    %24 = vector.shape_cast %23 : vector<1x128x128xbf16> to vector<128x128xbf16>
    %cst_17 = arith.constant dense<0.000000e+00> : vector<128x128xf32>
    %25 = tpu.matmul %22, %24, %cst_17 {dimension_numbers = #tpu.dot_dimension_numbers<[1], [0], [0], [1], [0, 0, 1, 1], [], []>} : vector<128x128xbf16>, vector<128x128xbf16>, vector<128x128xf32> -> vector<128x128xf32>
    %c2_18 = arith.constant 2 : index
    %c0_19 = arith.constant 0 : index
    %c0_20 = arith.constant 0 : index
    %26 = vector.load %arg3[%c2_18, %c0_19, %c0_20] : memref<4x1x128xf32, #tpu.memory_space<vmem>>, vector<1x1x128xf32>
    %27 = vector.shape_cast %26 : vector<1x1x128xf32> to vector<1x128xf32>
    %28 = vector.broadcast %27 : vector<1x128xf32> to vector<128x128xf32>
    %29 = arith.addf %25, %28 : vector<128x128xf32>
    %cst_21 = arith.constant 0.000000e+00 : f32
    %30 = vector.broadcast %cst_21 : f32 to vector<128x128xf32>
    %31 = arith.maximumf %29, %30 : vector<128x128xf32>
    %32 = arith.truncf %31 : vector<128x128xf32> to vector<128x128xbf16>
    %c3 = arith.constant 3 : index
    %c0_22 = arith.constant 0 : index
    %c0_23 = arith.constant 0 : index
    %33 = vector.load %arg2[%c3, %c0_22, %c0_23] : memref<4x128x128xbf16, #tpu.memory_space<vmem>>, vector<1x128x128xbf16>
    %34 = vector.shape_cast %33 : vector<1x128x128xbf16> to vector<128x128xbf16>
    %cst_24 = arith.constant dense<0.000000e+00> : vector<128x128xf32>
    %35 = tpu.matmul %32, %34, %cst_24 {dimension_numbers = #tpu.dot_dimension_numbers<[1], [0], [0], [1], [0, 0, 1, 1], [], []>} : vector<128x128xbf16>, vector<128x128xbf16>, vector<128x128xf32> -> vector<128x128xf32>
    %c3_25 = arith.constant 3 : index
    %c0_26 = arith.constant 0 : index
    %c0_27 = arith.constant 0 : index
    %36 = vector.load %arg3[%c3_25, %c0_26, %c0_27] : memref<4x1x128xf32, #tpu.memory_space<vmem>>, vector<1x1x128xf32>
    %37 = vector.shape_cast %36 : vector<1x1x128xf32> to vector<1x128xf32>
    %38 = vector.broadcast %37 : vector<1x128xf32> to vector<128x128xf32>
    %39 = arith.addf %35, %38 : vector<128x128xf32>
    %cst_28 = arith.constant 0.000000e+00 : f32
    %40 = vector.broadcast %cst_28 : f32 to vector<128x128xf32>
    %41 = arith.maximumf %39, %40 : vector<128x128xf32>
    %42 = arith.addf %41, %21 : vector<128x128xf32>
    %c0_29 = arith.constant 0 : index
    %c0_30 = arith.constant 0 : index
    %43 = vector.load %arg4[%c0_29, %c0_30] : memref<128x128xf32, #tpu.memory_space<vmem>>, vector<128x128xf32>
    tpu.vector_store %arg4[%c0_29, %c0_30], %42 {strides = array<i32>} : memref<128x128xf32, #tpu.memory_space<vmem>>, vector<128x128xf32>,
    return
  }
  func.func @transform_0(%arg0: i32) -> (i32, i32) {
    %c0_i32 = arith.constant 0 : i32
    %c0_i32_0 = arith.constant 0 : i32
    return %arg0, %c0_i32 : i32, i32
  }
  func.func @transform_1(%arg0: i32) -> (i32, i32, i32) {
    %c0_i32 = arith.constant 0 : i32
    %c0_i32_0 = arith.constant 0 : i32
    %c0_i32_1 = arith.constant 0 : i32
    %c0_i32_2 = arith.constant 0 : i32
    return %c0_i32, %c0_i32_0, %c0_i32_1 : i32, i32, i32
  }
  func.func @transform_2(%arg0: i32) -> (i32, i32, i32) {
    %c0_i32 = arith.constant 0 : i32
    %c0_i32_0 = arith.constant 0 : i32
    %c0_i32_1 = arith.constant 0 : i32
    %c0_i32_2 = arith.constant 0 : i32
    return %c0_i32, %c0_i32_0, %c0_i32_1 : i32, i32, i32
  }
  func.func @transform_3(%arg0: i32) -> (i32, i32) {
    %c0_i32 = arith.constant 0 : i32
    %c0_i32_0 = arith.constant 0 : i32
    return %arg0, %c0_i32 : i32, i32
  }
}

</mosaic_0001>

<bundles_post_ra>
// kernel: tpu_custom_call.1
= control target key start
LH: loop header
LB: loop body
LE: loop exit
PB: predicated region body
PF: predicated region fallthrough
CT: control target
= control target key end

     0   :  { %8 = vsyncpa [#allocation3], 0  ;;  %s2063_s0 = inlined_call_operand.hbm [shape: f32[256,128], index: 0, kind: input, shape index: {}]   ;;  %s2064_s1 = inlined_call_operand.hbm [shape: bf16[4,128,128], index: 1, kind: input, shape index: {}]   ;;  %s2065_s2 = inlined_call_operand.vmem [shape: f32[4,1,128], index: 2, kind: input, shape index: {}]   ;;  %s2066_s3 = inlined_call_operand.hbm [shape: f32[256,128], index: 3, kind: output, shape index: {}]  }
   0x1   :  { %10 = vsyncpa [#allocation3 + $0x1], 0 }
   0x2   :  { %11 = vsyncpa [#allocation6], 0 }
   0x3   :  { %12 = vsyncpa [#allocation4], 0 }
   0x4   :  { %14 = vsyncpa [#allocation4 + $0x1], 0  ;;  %s1645_s12 = smov 0   ;;  %s1647_s13 = smov 0  }
   0x5   :  { %s1649_s14 = smov 0   ;;  %s1651_s15 = smov 0  }
   0x6 LB: > { %s1666_s16 = sadd.s32 4294967295, %s1614_s15   ;;  %s1142_s17 = sadd.s32 4294967294, %s1614_s15   ;;  %s1614_s15 = sphi %s1651_s15, %s2086_s15   ;;  %s1610_s14 = sphi %s1649_s14, %s2085_s14   ;;  %s1606_s13 = sphi %s1647_s13, %s2084_s13   ;;  %s1602_s12 = sphi %s1645_s12, %s2083_s12  }
   0x7   : > { %p40_p0 = scmp.ne.s32.totalorder %s1606_s13, %s1602_s12  ;;  %p2067_p1 = scmp.eq.s32.totalorder %s1666_s16, 0 }
   0x8   : > { %p112_p3 = scmp.eq.s32.totalorder %s1142_s17, 1  ;;  %p1143_p5 = scmp.ge.s32.totalorder %s1614_s15, 1 }
   0x9   : > { %p1675_p4 = por %p2067_p1, %p40_p0  ;;  %p119_p7 = scmp.lt.s32.totalorder %s1614_s15, 3 }
   0xa   : > { %p1680_p6 = por %p112_p3, %p40_p0  ;;  %s1616_s21 = smov [#allocation5]  }
   0xb   : > { %s2070_s18 = scalar_select %p1675_p4, 1, 0 }
   0xc   : > { %s2071_s19 = scalar_select %p1680_p6, 1, 0 }
   0xd   : > { %p1685_p8 = pnand %p1143_p5, %p119_p7  ;;  %s131_s22 = sshll.u32 %s1616_s21, 4  ;;  %s1689_s22 = int_to_ptr.vmem [resolvable:$true] %s131_s22 }
   0xe   : > { %s1701_s24 = sadd.s32 1, %s1614_s15   ;;  %s27_s25 = sadd.s32 1, %s1610_s14 }
   0xf   : > { %s2072_s20 = scalar_select %p1685_p8, 1, 0 }
  0x10   : > { %p1399_p9 = pneg %p1685_p8  ;;  %s24_s26 = ssub.s32 %s1614_s15, %s1701_s24 }
  0x11   : > { %s1486_s29 = scalar_lea.hbm %s2064_s1, 4096 }
  0x12   : > { %p1696_p11 = pnand %p1399_p9, %p2067_p1  ;;  %p1487_p12 = scmp.ne.s32.totalorder %s2064_s1, %s1486_s29 }
  0x13   : > { %p1493_p5 = scmp.lt.u32.totalorder %s1486_s29, %s2064_s1 }
  0x14   : > { %p1488_p13 = pneg %p1696_p11 }
  0x16   : > { %p1489_p0 = pnand %p1488_p13, %p1487_p12 }
  0x18   : > { %p1490_p3 = pneg %p1489_p0 }
  0x1a   : > { %p1495_p7 = pnand %p1493_p5, %p1490_p3 }
  0x1c   : > { %1498 = shalt.err (!%p1495_p7)
}
  0x1d   : > { %s1499_s7 = scalar_lea.vmem %s1689_s22, 4096  ;;  %p1507_p2 = scmp.lt.s32.totalorder %s1689_s22, %s1689_s22 }
  0x1e   : > { %p1500_p9 = scmp.ne.s32.totalorder %s1689_s22, %s1499_s7  ;;  %p1508_p6 = scmp.lt.s32.totalorder %s1499_s7, %s1499_s7 }
  0x20   : > { %p1502_p10 = pnand %p1500_p9, %p1488_p13  ;;  %p1509_p4 = por %p1508_p6, %p1507_p2 }
  0x22   : > { %p1503_p1 = pneg %p1502_p10 }
  0x24   : > { %p1510_p8 = pnand %p1509_p4, %p1503_p1 }
  0x26   : > { %1513 = shalt.err (!%p1510_p8)
}
  0x27   : > { %s1617_s8 = smov 64   ;;  %s1618_s9 = smov 4  }
  0x28   : > { %1402 = dma.hbm_to_vmem [thread:$0]  (!%p1696_p11), %s2064_s1, 4096, %s1689_s22, [#allocation6], %s1617_s8, %s1617_s8, %s1618_s9  }
  0x29   : > { %p25_p2 = scmp.eq.s32.totalorder %s24_s26, 0  ;;  %p34_p1 = scmp.ne.s32.totalorder %s1610_s14, %s1606_s13 }
  0x2a   : > { %p35_p4 = scmp.eq.s32.totalorder %s1614_s15, 0  ;;  %p1412_p6 = scmp.lt.s32.totalorder %s1614_s15, 2 }
  0x2b   : > { %s1732_s17 = scalar_select %p25_p2, %s1610_s14, %s27_s25  }
  0x2c   : > { %p36_p8 = por %p35_p4, %p34_p1  ;;  %p2074_p10 = scmp.eq.s32.totalorder %s1666_s16, 1 }
  0x2d   : > { %s148_s27 = sand.u32 1, %s1610_s14   ;;  %s1197_s28 = sshll.u32 %s1614_s15, 11 }
  0x2e   : > { %p1736_p12 = por %p2074_p10, %p34_p1  ;;  %s1146_s29 = sshll.u32 %s148_s27, 7 }
  0x2f   : > { %s1745_s4 = scalar_lea.hbm %s2063_s0, %s1197_s28  ;;  %s152_s22 = scalar_lea.vmem [#allocation2], %s1146_s29 }
  0x30   : > { %s159_s25 = sshll.u32 %s152_s22, 4  ;;  %p1747_p11 = pnand %p1412_p6, %p36_p8  ;;  %s1751_s25 = int_to_ptr.vmem [resolvable:$true] %s159_s25 }
  0x31   : > { %s1753_s5 = scalar_lea.sflag [#allocation3], %s148_s27  ;;  %s1514_s6 = scalar_lea.hbm %s1745_s4, 2048 }
  0x32   : > { %p1515_p13 = scmp.ne.s32.totalorder %s1745_s4, %s1514_s6  ;;  %p1516_p0 = pneg %p1747_p11 }
  0x33   : > { %s1519_s9 = scalar_lea.hbm %s2063_s0, 4096  ;;  %p1520_p7 = scmp.lt.u32.totalorder %s1745_s4, %s2063_s0 }
  0x34   : > { %p1517_p3 = pnand %p1516_p0, %p1515_p13  ;;  %p1521_p9 = scmp.lt.u32.totalorder %s1519_s9, %s1514_s6 }
  0x35   : > { %p1523_p1 = scmp.lt.u32.totalorder %s1514_s6, %s1745_s4 }
  0x36   : > { %p1518_p5 = pneg %p1517_p3  ;;  %p1522_p2 = por %p1521_p9, %p1520_p7 }
  0x38   : > { %p1524_p4 = por %p1523_p1, %p1522_p2 }
  0x3a   : > { %p1525_p6 = pnand %p1524_p4, %p1518_p5 }
  0x3c   : > { %1528 = shalt.err (!%p1525_p6)
}
  0x3d   : > { %s1529_s27 = scalar_lea.vmem %s1751_s25, 2048  ;;  %s1619_s28 = smov [#allocation2]  }
  0x3e   : > { %p1530_p8 = scmp.ne.s32.totalorder %s1751_s25, %s1529_s27  ;;  %s1534_s29 = sshll.u32 %s1619_s28, 4  ;;  %s1535_s29 = int_to_ptr.vmem [resolvable:$false] %s1534_s29 }
  0x3f   : > { %s1536_s23 = scalar_lea.vmem %s1535_s29, 4096  ;;  %p1537_p3 = scmp.lt.s32.totalorder %s1751_s25, %s1535_s29 }
  0x40   : > { %p1532_p10 = pnand %p1530_p8, %p1516_p0  ;;  %p1538_p7 = scmp.lt.s32.totalorder %s1536_s23, %s1529_s27 }
  0x42   : > { %p1533_p13 = pneg %p1532_p10  ;;  %p1539_p9 = por %p1538_p7, %p1537_p3 }
  0x44   : > { %p1540_p2 = pnand %p1539_p9, %p1533_p13 }
  0x46   : > { %1543 = shalt.err (!%p1540_p2)
}
  0x47   : > { %s1620_s30 = smov 128   ;;  %s1621_s22 = smov 8  }
  0x48   : > { %1406 = dma.hbm_to_vmem [thread:$0]  (!%p1747_p11), %s1745_s4, 2048, %s1751_s25, %s1753_s5, %s1620_s30, %s1620_s30, %s1621_s22  }
  0x49   : > { %p2077_p0 = scmp.ne.s32.totalorder %s2072_s20, 0 }
  0x4a   : > { %s1784_s6 = sand.u32 (!%p2077_p0), 1, %s1606_s13   ;;  %p2078_p5 = scmp.ne.s32.totalorder (!%p2077_p0), %s2070_s18, 0 }
  0x4b   : > { %171 = sbr.rel (%p2077_p0) target bundleno = 1047 (0x417), region = 32  ;;  %s1150_s7 = sshll.u32 (!%p2077_p0), %s1784_s6, 7 }
  0x4c   : > { %s174_s8 = scalar_lea.sflag (!%p2077_p0), [#allocation3], %s1784_s6  ;;  %s1790_s9 = scalar_lea.vmem (!%p2077_p0), [#allocation2], %s1150_s7 }
  0x52   : > { %1589 = dma.done.wait (%p2078_p5), %s174_s8, 2048  }
  0x53   : > { %1591 = vsyncadd (%p2078_p5), %s174_s8, 4294965248  ;;  %p2079_p11 = scmp.eq.s32.totalorder %s1666_s16, 0 }
  0x55   : > { %1593 = dma.done.wait (%p2079_p11), [#allocation6], 4096   ;;  %p2080_p1 = pmov %p2079_p11 }
  0x56   : > { %v1454_v0 = vld [vmem:[#allocation5] sm:$0xff]   ;;  %v1455_v1 = vld [vmem:[#allocation5 + $0x8] sm:$0xff]   ;;  %v1456_v2 = vld [vmem:[#allocation5 + $0x10] sm:$0xff]   ;;  %s1968_s27 = scalar_lea.vmem [#allocation7], %s1150_s7  ;;  %s1198_s28 = sshll.u32 %s1666_s16, 11 }
  0x57   : > { %1595 = vsyncadd (%p2080_p1), [#allocation6], 4294963200  ;;  %1263 = vmatprep.subr.bf16.mxu0 %v1454_v0  ;;  %v1457_v3 = vld [vmem:[#allocation5 + $0x18] sm:$0xff]   ;;  %v1801_v4 = vld [vmem:[%s1790_s9] sm:$0xff]  ;;  %s1059_s29 = sshll.u32 %s1968_s27, 4  ;;  %s2013_s22 = scalar_lea.hbm %s2066_s3, %s1198_s28  ;;  %s2015_s29 = int_to_ptr.vmem [resolvable:$true] %s1059_s29 }
  0x58   : > { %1264 = vmatpush3.bf16.msra.mxu0 %v1454_v0  ;;  %v1804_v5 = vld [vmem:[%s1790_s9 + $0x8] sm:$0xff]  ;;  %v1458_v7 = vld [vmem:[#allocation5 + $0x20] sm:$0xff]   ;;  %v1464_v11 = vld [vmem:[#allocation5 + $0x50] sm:$0xff]   ;;  %s1046_s16 = scalar_lea.sflag [#allocation4], %s1784_s6  ;;  %s1544_s7 = scalar_lea.vmem %s2015_s29, 2048 }
  0x59   : > { %1265 = vmatprep.subr.bf16.mxu0 %v1455_v1  ;;  %v223_v6 = vpack.c.bf16 %v1804_v5, %v1801_v4  ;;  %v1462_v8 = vld [vmem:[#allocation5 + $0x40] sm:$0xff]   ;;  %v1463_v9 = vld [vmem:[#allocation5 + $0x48] sm:$0xff]   ;;  %v1460_v12 = vld [vmem:[#allocation5 + $0x30] sm:$0xff]   ;;  %p1545_p4 = scmp.ne.s32.totalorder %s2015_s29, %s1544_s7  ;;  %s1622_s8 = smov [#allocation7]  }
  0x5a   : > { %v1459_v10 = vld [vmem:[#allocation5 + $0x28] sm:$0xff]   ;;  %1295 = vmatprep.subr.bf16.mxu1 %v1462_v8  ;;  %v1465_v13 = vld [vmem:[#allocation5 + $0x58] sm:$0xff]   ;;  %v1466_v15 = vld [vmem:[#allocation5 + $0x60] sm:$0xff]  }
  0x5b   : > { %1279 = vmatprep.mubr.bf16.mxu0 %v223_v6  ;;  %1296 = vmatpush3.bf16.msra.mxu1 %v1462_v8  ;;  %v1461_v14 = vld [vmem:[#allocation5 + $0x38] sm:$0xff]   ;;  %v1809_v16 = vld [vmem:[%s1790_s9 + $0x10] sm:$0xff]  ;;  %v1815_v18 = vld [vmem:[%s1790_s9 + $0x20] sm:$0xff]  ;;  %p1546_p6 = pnand %p1545_p4, %p1736_p12 }
  0x5c   : > { %1266 = vmatpush3.bf16.msra.mxu0 %v1455_v1  ;;  %1297 = vmatprep.subr.bf16.mxu1 %v1463_v9  ;;  %v1812_v17 = vld [vmem:[%s1790_s9 + $0x18] sm:$0xff]  ;;  %v1818_v19 = vld [vmem:[%s1790_s9 + $0x28] sm:$0xff]  ;;  %v1825_v23 = vld [vmem:[%s1790_s9 + $0x30] sm:$0xff] }
  0x5d   : > { %1267 = vmatprep.subr.bf16.mxu0 %v1456_v2  ;;  %v1467_v20 = vld [vmem:[#allocation5 + $0x68] sm:$0xff]   ;;  %v224_v21 = vpack.c.bf16 %v1812_v17, %v1809_v16  ;;  %v225_v22 = vpack.c.bf16 %v1818_v19, %v1815_v18  ;;  %v1828_v24 = vld [vmem:[%s1790_s9 + $0x38] sm:$0xff]  ;;  %v1831_v25 = vld [vmem:[%s1790_s9 + $0x40] sm:$0xff]  ;;  %p1547_p8 = pneg %p1546_p6 }
  0x5e   : > { %v1834_v26 = vld [vmem:[%s1790_s9 + $0x48] sm:$0xff]  ;;  %v226_v27 = vpack.c.bf16 %v1828_v24, %v1825_v23  ;;  %v1841_v29 = vld [vmem:[%s1790_s9 + $0x50] sm:$0xff]  ;;  %v1844_v30 = vld [vmem:[%s1790_s9 + $0x58] sm:$0xff] }
  0x5f   : > { %1298 = vmatpush3.bf16.msra.mxu1 %v1463_v9  ;;  %v227_v28 = vpack.c.bf16 %v1834_v26, %v1831_v25  ;;  %v1847_v31 = vld [vmem:[%s1790_s9 + $0x60] sm:$0xff]  ;;  %v1850_v32 = vld [vmem:[%s1790_s9 + $0x68] sm:$0xff]  ;;  %v228_v33 = vpack.c.bf16 %v1844_v30, %v1841_v29  ;;  %v1857_v35 = vld [vmem:[%s1790_s9 + $0x70] sm:$0xff] }
  0x60   : > { %1268 = vmatpush3.bf16.msra.mxu0 %v1456_v2  ;;  %1299 = vmatprep.subr.bf16.mxu1 %v1464_v11  ;;  %v229_v34 = vpack.c.bf16 %v1850_v32, %v1847_v31  ;;  %v1860_v36 = vld [vmem:[%s1790_s9 + $0x78] sm:$0xff]  ;;  %v1468_v38 = vld [vmem:[#allocation5 + $0x70] sm:$0xff]   ;;  %v1470_v40 = vld [vmem:[#allocation5 + $0x80] sm:$0xff]   ;;  %s1548_s9 = sshll.u32 %s1622_s8, 4  ;;  %s1549_s9 = int_to_ptr.vmem [resolvable:$false] %s1548_s9 }
  0x61   : > { %1269 = vmatprep.subr.bf16.mxu0 %v1457_v3  ;;  %v230_v37 = vpack.c.bf16 %v1860_v36, %v1857_v35  ;;  %v1469_v39 = vld [vmem:[#allocation5 + $0x78] sm:$0xff]   ;;  %v1471_v41 = vld [vmem:[#allocation5 + $0x88] sm:$0xff]   ;;  %v1472_v42 = vld [vmem:[#allocation5 + $0x90] sm:$0xff]   ;;  %s1550_s18 = scalar_lea.vmem %s1549_s9, 4096  ;;  %p1551_p10 = scmp.lt.s32.totalorder %s2015_s29, %s1549_s9 }
  0x62   : > { %v1473_v43 = vld [vmem:[#allocation5 + $0x98] sm:$0xff]   ;;  %v1474_v44 = vld [vmem:[#allocation5 + $0xa0] sm:$0xff]   ;;  %p1552_p13 = scmp.lt.s32.totalorder %s1550_s18, %s1544_s7 }
  0x63   : > { %1300 = vmatpush3.bf16.msra.mxu1 %v1464_v11  ;;  %v1153_v45 = vld [vmem:[%s2065_s2] ss:$0 sm:$0xff] }
  0x64   : > { %1270 = vmatpush3.bf16.msra.mxu0 %v1457_v3  ;;  %1301 = vmatprep.subr.bf16.mxu1 %v1465_v13  ;;  %p1553_p3 = por %p1552_p13, %p1551_p10 }
  0x65   : > { %1271 = vmatprep.subr.bf16.mxu0 %v1458_v7 }
  0x66   : > { %p1554_p7 = pnand %p1553_p3, %p1547_p8 }
  0x67   : > { %1302 = vmatpush3.bf16.msra.mxu1 %v1465_v13 }
  0x68   : > { %1272 = vmatpush3.bf16.msra.mxu0 %v1458_v7  ;;  %1303 = vmatprep.subr.bf16.mxu1 %v1466_v15 }
  0x69   : > { %1273 = vmatprep.subr.bf16.mxu0 %v1459_v10 }
  0x6b   : > { %1304 = vmatpush3.bf16.msra.mxu1 %v1466_v15 }
  0x6c   : > { %1274 = vmatpush3.bf16.msra.mxu0 %v1459_v10  ;;  %1305 = vmatprep.subr.bf16.mxu1 %v1467_v20 }
  0x6d   : > { %1275 = vmatprep.subr.bf16.mxu0 %v1460_v12 }
  0x6f   : > { %1306 = vmatpush3.bf16.msra.mxu1 %v1467_v20 }
  0x70   : > { %1276 = vmatpush3.bf16.msra.mxu0 %v1460_v12  ;;  %1307 = vmatprep.subr.bf16.mxu1 %v1468_v38 }
  0x71   : > { %1277 = vmatprep.subr.bf16.mxu0 %v1461_v14 }
  0x73   : > { %1308 = vmatpush3.bf16.msra.mxu1 %v1468_v38 }
  0x74   : > { %1278 = vmatpush3.bf16.msra.mxu0 %v1461_v14  ;;  %1309 = vmatprep.subr.bf16.mxu1 %v1469_v39 }
  0x75   : > { %1327 = vmatprep.subr.bf16.mxu0 %v1470_v40 }
  0x77   : > { %1280 = vmatmul.mubr.bf16.vlgmr.msra.gmra.mrb[0].mxu0 %v224_v21  ;;  %1310 = vmatpush3.bf16.msra.mxu1 %v1469_v39 }
  0x78   : > { %1283 = vmatprep.mubr.bf16.mxu0 %v225_v22  ;;  %1328 = vmatpush3.bf16.msra.mxu0 %v1470_v40 }
  0x79   : > { %1329 = vmatprep.subr.bf16.mxu0 %v1471_v41 }
  0x7c   : > { %1330 = vmatpush3.bf16.msra.mxu0 %v1471_v41 }
  0x7d   : > { %1331 = vmatprep.subr.bf16.mxu0 %v1472_v42 }
  0x7f   : > { %1284 = vmatmul.mubr.bf16.gmra.mrb[4].mxu0 %v226_v27 }
  0x80   : > { %1287 = vmatprep.mubr.bf16.mxu0 %v227_v28  ;;  %1332 = vmatpush3.bf16.msra.mxu0 %v1472_v42 }
  0x81   : > { %1333 = vmatprep.subr.bf16.mxu0 %v1473_v43 }
  0x84   : > { %1334 = vmatpush3.bf16.msra.mxu0 %v1473_v43 }
  0x85   : > { %1335 = vmatprep.subr.bf16.mxu0 %v1474_v44 }
  0x87   : > { %1288 = vmatmul.mubr.bf16.gmra.mrb[8].mxu0 %v228_v33 }
  0x88   : > { %1291 = vmatprep.mubr.bf16.mxu0 %v229_v34  ;;  %1336 = vmatpush3.bf16.msra.mxu0 %v1474_v44 }
  0x8f   : > { %1292 = vmatmul.mubr.bf16.gmra.mrb[12].mxu0 %v230_v37 }
 0x14a   : > { %v1281_v46 = vpop.f32.mrb[0].mxu0 }
 0x14b   : > { %v345_v47 = vadd.f32 %v1281_v46, %v1153_v45  ;;  %v336_v48 = vpop.f32.mrb[1].mxu0 }
 0x14c   : > { %v337_v49 = vadd.f32 %v1153_v45, %v336_v48  ;;  %v1282_v50 = vpop.f32.mrb[2].mxu0 }
 0x14d   : > { %v348_v51 = vadd.f32 %v1282_v50, %v1153_v45  ;;  %v339_v52 = vpop.f32.mrb[3].mxu0  ;;  %v401_v54 = vmax.f32 %v345_v47, 0.0 }
 0x14e   : > { %v340_v53 = vadd.f32 %v1153_v45, %v339_v52  ;;  %v399_v56 = vmax.f32 %v337_v49, 0.0 }
 0x14f   : > { %v402_v55 = vmax.f32 %v348_v51, 0.0 }
 0x150   : > { %v400_v57 = vmax.f32 %v340_v53, 0.0 }
 0x151   : > { %v416_v58 = vpack.c.bf16 %v402_v55, %v401_v54  ;;  %v1475_v55 = vld [vmem:[#allocation5 + $0xa8] sm:$0xff]  }
 0x152   : > { %v1285_v59 = vpop.f32.mrb[4].mxu0  ;;  %v415_v60 = vpack.c.bf16 %v400_v57, %v399_v56  ;;  %1337 = vmatprep.subr.bf16.mxu0 %v1475_v55  ;;  %v1476_v56 = vld [vmem:[#allocation5 + $0xb0] sm:$0xff]   ;;  %v1477_v57 = vld [vmem:[#allocation5 + $0xb8] sm:$0xff]  }
 0x153   : > { %v361_v61 = vadd.f32 %v1285_v59, %v1153_v45  ;;  %v352_v62 = vpop.f32.mrb[5].mxu0  ;;  %1338 = vmatpush3.bf16.msra.mxu0 %v1475_v55  ;;  %v1479_v59 = vld [vmem:[#allocation5 + $0xc8] sm:$0xff]  }
 0x154   : > { %v353_v63 = vadd.f32 %v1153_v45, %v352_v62  ;;  %v1286_v0 = vpop.f32.mrb[6].mxu0  ;;  %1311 = vmatprep.mubr.bf16.mxu1 %v415_v60  ;;  %1339 = vmatprep.subr.bf16.mxu0 %v1476_v56  ;;  %v1481_v60 = vld [vmem:[#allocation5 + $0xd8] sm:$0xff]   ;;  %v1483_v62 = vld [vmem:[#allocation5 + $0xe8] sm:$0xff]  }
 0x155   : > { %v364_v1 = vadd.f32 %v1286_v0, %v1153_v45  ;;  %v355_v2 = vpop.f32.mrb[7].mxu0  ;;  %1312 = vmatmul.mubr.bf16.vlgmr.msra.gmra.mrb[0].mxu1 %v416_v58  ;;  %v405_v6 = vmax.f32 %v361_v61, 0.0  ;;  %v1478_v58 = vld [vmem:[#allocation5 + $0xc0] sm:$0xff]  }
 0x156   : > { %v356_v3 = vadd.f32 %v1153_v45, %v355_v2  ;;  %v403_v8 = vmax.f32 %v353_v63, 0.0  ;;  %1359 = vmatprep.subr.bf16.mxu1 %v1478_v58  ;;  %v1482_v61 = vld [vmem:[#allocation5 + $0xe0] sm:$0xff]  }
 0x157   : > { %v406_v7 = vmax.f32 %v364_v1, 0.0  ;;  %1340 = vmatpush3.bf16.msra.mxu0 %v1476_v56  ;;  %1360 = vmatpush3.bf16.msra.mxu1 %v1478_v58  ;;  %v1870_v63 = vld [vmem:[%s2065_s2 + $0x1] ss:$0 sm:$0xff] }
 0x158   : > { %v404_v9 = vmax.f32 %v356_v3, 0.0  ;;  %1341 = vmatprep.subr.bf16.mxu0 %v1477_v57  ;;  %1361 = vmatprep.subr.bf16.mxu1 %v1479_v59 }
 0x159   : > { %v418_v10 = vpack.c.bf16 %v406_v7, %v405_v6 }
 0x15a   : > { %v417_v11 = vpack.c.bf16 %v404_v9, %v403_v8  ;;  %v1289_v12 = vpop.f32.mrb[8].mxu0 }
 0x15b   : > { %v377_v13 = vadd.f32 %v1289_v12, %v1153_v45  ;;  %v368_v14 = vpop.f32.mrb[9].mxu0  ;;  %1342 = vmatpush3.bf16.msra.mxu0 %v1477_v57  ;;  %1362 = vmatpush3.bf16.msra.mxu1 %v1479_v59 }
 0x15c   : > { %v369_v15 = vadd.f32 %v1153_v45, %v368_v14  ;;  %v1290_v20 = vpop.f32.mrb[10].mxu0  ;;  %1315 = vmatprep.mubr.bf16.mxu1 %v417_v11 }
 0x15d   : > { %v380_v21 = vadd.f32 %v1290_v20, %v1153_v45  ;;  %v371_v22 = vpop.f32.mrb[11].mxu0  ;;  %1316 = vmatmul.mubr.bf16.gmra.mrb[4].mxu1 %v418_v10  ;;  %v409_v28 = vmax.f32 %v377_v13, 0.0 }
 0x15e   : > { %v372_v27 = vadd.f32 %v1153_v45, %v371_v22  ;;  %v407_v34 = vmax.f32 %v369_v15, 0.0 }
 0x15f   : > { %v410_v33 = vmax.f32 %v380_v21, 0.0 }
 0x160   : > { %v408_v37 = vmax.f32 %v372_v27, 0.0 }
 0x161   : > { %v420_v38 = vpack.c.bf16 %v410_v33, %v409_v28 }
 0x162   : > { %v419_v39 = vpack.c.bf16 %v408_v37, %v407_v34  ;;  %v1293_v40 = vpop.f32.mrb[12].mxu0 }
 0x163   : > { %v393_v41 = vadd.f32 %v1293_v40, %v1153_v45  ;;  %v384_v42 = vpop.f32.mrb[13].mxu0 }
 0x164   : > { %v385_v43 = vadd.f32 %v1153_v45, %v384_v42  ;;  %v1294_v44 = vpop.f32.mrb[14].mxu0  ;;  %1319 = vmatprep.mubr.bf16.mxu1 %v419_v39 }
 0x165   : > { %v396_v46 = vadd.f32 %v1294_v44, %v1153_v45  ;;  %v387_v47 = vpop.f32.mrb[15].mxu0  ;;  %1320 = vmatmul.mubr.bf16.gmra.mrb[8].mxu1 %v420_v38  ;;  %v413_v49 = vmax.f32 %v393_v41, 0.0 }
 0x166   : > { %v388_v48 = vadd.f32 %v1153_v45, %v387_v47  ;;  %v411_v51 = vmax.f32 %v385_v43, 0.0  ;;  %v1480_v45 = vld [vmem:[#allocation5 + $0xd0] sm:$0xff]  }
 0x167   : > { %v414_v50 = vmax.f32 %v396_v46, 0.0  ;;  %1363 = vmatprep.subr.bf16.mxu1 %v1480_v45 }
 0x168   : > { %v412_v52 = vmax.f32 %v388_v48, 0.0  ;;  %1364 = vmatpush3.bf16.msra.mxu1 %v1480_v45 }
 0x169   : > { %v422_v53 = vpack.c.bf16 %v414_v50, %v413_v49  ;;  %1365 = vmatprep.subr.bf16.mxu1 %v1481_v60 }
 0x16a   : > { %v421_v54 = vpack.c.bf16 %v412_v52, %v411_v51 }
 0x16c   : > { %1323 = vmatprep.mubr.bf16.mxu1 %v421_v54  ;;  %1366 = vmatpush3.bf16.msra.mxu1 %v1481_v60 }
 0x16d   : > { %1324 = vmatmul.mubr.bf16.gmra.mrb[12].mxu1 %v422_v53  ;;  %1367 = vmatprep.subr.bf16.mxu1 %v1482_v61 }
 0x170   : > { %1368 = vmatpush3.bf16.msra.mxu1 %v1482_v61 }
 0x171   : > { %1369 = vmatprep.subr.bf16.mxu1 %v1483_v62 }
 0x174   : > { %1370 = vmatpush3.bf16.msra.mxu1 %v1483_v62 }
 0x228   : > { %v1313_v0 = vpop.f32.mrb[0].mxu1 }
 0x229   : > { %v539_v1 = vadd.f32 %v1313_v0, %v1870_v63  ;;  %v530_v2 = vpop.f32.mrb[1].mxu1 }
 0x22a   : > { %v531_v3 = vadd.f32 %v1870_v63, %v530_v2  ;;  %v1314_v6 = vpop.f32.mrb[2].mxu1 }
 0x22b   : > { %v542_v7 = vadd.f32 %v1314_v6, %v1870_v63  ;;  %v533_v8 = vpop.f32.mrb[3].mxu1  ;;  %v595_v11 = vmax.f32 %v539_v1, 0.0 }
 0x22c   : > { %v593_v9 = vmax.f32 %v531_v3, 0.0  ;;  %v534_v10 = vadd.f32 %v1870_v63, %v533_v8 }
 0x22d   : > { %v596_v12 = vmax.f32 %v542_v7, 0.0  ;;  %v1886_v22 = vadd.f32 %v595_v11, %v1809_v16 }
 0x22e   : > { %v594_v13 = vmax.f32 %v534_v10, 0.0  ;;  %v1880_v15 = vadd.f32 %v593_v9, %v1801_v4 }
 0x22f   : > { %v1877_v14 = vadd.f32 %v596_v12, %v1812_v17 }
 0x230   : > { %v1883_v20 = vadd.f32 %v594_v13, %v1804_v5  ;;  %v1317_v21 = vpop.f32.mrb[4].mxu1 }
 0x231   : > { %v555_v27 = vadd.f32 %v1317_v21, %v1870_v63  ;;  %v546_v28 = vpop.f32.mrb[5].mxu1  ;;  %v626_v4 = vpack.c.bf16 %v1877_v14, %v1886_v22  ;;  %v1484_v21 = vld [vmem:[#allocation5 + $0xf0] sm:$0xff]  }
 0x232   : > { %v547_v33 = vadd.f32 %v1870_v63, %v546_v28  ;;  %v1318_v34 = vpop.f32.mrb[6].mxu1  ;;  %v625_v17 = vpack.c.bf16 %v1883_v20, %v1880_v15  ;;  %1371 = vmatprep.subr.bf16.mxu1 %v1484_v21 }
 0x233   : > { %v558_v37 = vadd.f32 %v1318_v34, %v1870_v63  ;;  %v549_v5 = vpop.f32.mrb[7].mxu1  ;;  %v599_v16 = vmax.f32 %v555_v27, 0.0  ;;  %1372 = vmatpush3.bf16.msra.mxu1 %v1484_v21 }
 0x234   : > { %v597_v38 = vmax.f32 %v547_v33, 0.0  ;;  %v550_v39 = vadd.f32 %v1870_v63, %v549_v5  ;;  %1343 = vmatprep.mubr.bf16.mxu0 %v625_v17 }
 0x235   : > { %v600_v40 = vmax.f32 %v558_v37, 0.0  ;;  %1344 = vmatmul.mubr.bf16.vlgmr.msra.gmra.mrb[16].mxu0 %v626_v4  ;;  %v1906_v47 = vadd.f32 %v599_v16, %v1825_v23 }
 0x236   : > { %v598_v41 = vmax.f32 %v550_v39, 0.0  ;;  %v1900_v43 = vadd.f32 %v597_v38, %v1815_v18 }
 0x237   : > { %v1897_v42 = vadd.f32 %v600_v40, %v1828_v24 }
 0x238   : > { %v1903_v44 = vadd.f32 %v598_v41, %v1818_v19  ;;  %v1321_v46 = vpop.f32.mrb[8].mxu1 }
 0x239   : > { %v571_v48 = vadd.f32 %v1321_v46, %v1870_v63  ;;  %v562_v49 = vpop.f32.mrb[9].mxu1  ;;  %v628_v19 = vpack.c.bf16 %v1897_v42, %v1906_v47 }
 0x23a   : > { %v563_v50 = vadd.f32 %v1870_v63, %v562_v49  ;;  %v1322_v51 = vpop.f32.mrb[10].mxu1  ;;  %v627_v24 = vpack.c.bf16 %v1903_v44, %v1900_v43 }
 0x23b   : > { %v574_v52 = vadd.f32 %v1322_v51, %v1870_v63  ;;  %v565_v18 = vpop.f32.mrb[11].mxu1  ;;  %v603_v23 = vmax.f32 %v571_v48, 0.0 }
 0x23c   : > { %v601_v53 = vmax.f32 %v563_v50, 0.0  ;;  %v566_v54 = vadd.f32 %v1870_v63, %v565_v18  ;;  %1347 = vmatprep.mubr.bf16.mxu0 %v627_v24 }
 0x23d   : > { %v604_v55 = vmax.f32 %v574_v52, 0.0  ;;  %1348 = vmatmul.mubr.bf16.gmra.mrb[20].mxu0 %v628_v19  ;;  %v1926_v60 = vadd.f32 %v603_v23, %v1841_v29 }
 0x23e   : > { %v602_v56 = vmax.f32 %v566_v54, 0.0  ;;  %v1920_v58 = vadd.f32 %v601_v53, %v1831_v25 }
 0x23f   : > { %v1917_v57 = vadd.f32 %v604_v55, %v1844_v30 }
 0x240   : > { %v1923_v59 = vadd.f32 %v602_v56, %v1834_v26  ;;  %v1325_v45 = vpop.f32.mrb[12].mxu1 }
 0x241   : > { %v587_v61 = vadd.f32 %v1325_v45, %v1870_v63  ;;  %v578_v62 = vpop.f32.mrb[13].mxu1  ;;  %v630_v26 = vpack.c.bf16 %v1917_v57, %v1926_v60 }
 0x242   : > { %v579_v0 = vadd.f32 %v1870_v63, %v578_v62  ;;  %v1326_v1 = vpop.f32.mrb[14].mxu1  ;;  %v629_v30 = vpack.c.bf16 %v1923_v59, %v1920_v58 }
 0x243   : > { %v590_v2 = vadd.f32 %v1326_v1, %v1870_v63  ;;  %v581_v25 = vpop.f32.mrb[15].mxu1  ;;  %v607_v29 = vmax.f32 %v587_v61, 0.0 }
 0x244   : > { %v605_v3 = vmax.f32 %v579_v0, 0.0  ;;  %v582_v6 = vadd.f32 %v1870_v63, %v581_v25  ;;  %1351 = vmatprep.mubr.bf16.mxu0 %v629_v30 }
 0x245   : > { %v608_v7 = vmax.f32 %v590_v2, 0.0  ;;  %1352 = vmatmul.mubr.bf16.gmra.mrb[24].mxu0 %v630_v26  ;;  %v1946_v12 = vadd.f32 %v607_v29, %v1857_v35 }
 0x246   : > { %v606_v8 = vmax.f32 %v582_v6, 0.0  ;;  %v1940_v10 = vadd.f32 %v605_v3, %v1847_v31  ;;  %v1173_v31 = vld [vmem:[%s2065_s2 + $0x2] ss:$0 sm:$0xff] }
 0x247   : > { %v1937_v9 = vadd.f32 %v608_v7, %v1860_v36  ;;  %v1485_v36 = vld [vmem:[#allocation5 + $0xf8] sm:$0xff]  }
 0x248   : > { %v1943_v11 = vadd.f32 %v606_v8, %v1850_v32  ;;  %1373 = vmatprep.subr.bf16.mxu1 %v1485_v36 }
 0x249   : > { %v632_v13 = vpack.c.bf16 %v1937_v9, %v1946_v12  ;;  %1374 = vmatpush3.bf16.msra.mxu1 %v1485_v36 }
 0x24a   : > { %v631_v63 = vpack.c.bf16 %v1943_v11, %v1940_v10 }
 0x24c   : > { %1355 = vmatprep.mubr.bf16.mxu0 %v631_v63 }
 0x24d   : > { %1356 = vmatmul.mubr.bf16.gmra.mrb[28].mxu0 %v632_v13 }
 0x308   : > { %v1345_v32 = vpop.f32.mrb[16].mxu0 }
 0x309   : > { %v749_v35 = vadd.f32 %v1345_v32, %v1173_v31  ;;  %v740_v27 = vpop.f32.mrb[17].mxu0 }
 0x30a   : > { %v741_v28 = vadd.f32 %v1173_v31, %v740_v27  ;;  %v1346_v33 = vpop.f32.mrb[18].mxu0 }
 0x30b   : > { %v752_v34 = vadd.f32 %v1346_v33, %v1173_v31  ;;  %v743_v17 = vpop.f32.mrb[19].mxu0  ;;  %v805_v37 = vmax.f32 %v749_v35, 0.0 }
 0x30c   : > { %v744_v4 = vadd.f32 %v1173_v31, %v743_v17  ;;  %v803_v38 = vmax.f32 %v741_v28, 0.0 }
 0x30d   : > { %v806_v5 = vmax.f32 %v752_v34, 0.0 }
 0x30e   : > { %v804_v39 = vmax.f32 %v744_v4, 0.0 }
 0x30f   : > { %v820_v16 = vpack.c.bf16 %v806_v5, %v805_v37  ;;  %v1958_v5 = vld [vmem:[%s2065_s2 + $0x3] ss:$0 sm:$0xff] }
 0x310   : > { %v819_v40 = vpack.c.bf16 %v804_v39, %v803_v38  ;;  %v1349_v41 = vpop.f32.mrb[20].mxu0 }
 0x311   : > { %v765_v46 = vadd.f32 %v1349_v41, %v1173_v31  ;;  %v756_v48 = vpop.f32.mrb[21].mxu0 }
 0x312   : > { %v757_v49 = vadd.f32 %v1173_v31, %v756_v48  ;;  %v1350_v50 = vpop.f32.mrb[22].mxu0  ;;  %1375 = vmatprep.mubr.bf16.mxu1 %v819_v40 }
 0x313   : > { %v768_v51 = vadd.f32 %v1350_v50, %v1173_v31  ;;  %v759_v24 = vpop.f32.mrb[23].mxu0  ;;  %1376 = vmatmul.mubr.bf16.vlgmr.msra.gmra.mrb[16].mxu1 %v820_v16  ;;  %v809_v18 = vmax.f32 %v765_v46, 0.0 }
 0x314   : > { %v760_v52 = vadd.f32 %v1173_v31, %v759_v24  ;;  %v807_v53 = vmax.f32 %v757_v49, 0.0 }
 0x315   : > { %v810_v19 = vmax.f32 %v768_v51, 0.0 }
 0x316   : > { %v808_v54 = vmax.f32 %v760_v52, 0.0 }
 0x317   : > { %v822_v23 = vpack.c.bf16 %v810_v19, %v809_v18 }
 0x318   : > { %v821_v55 = vpack.c.bf16 %v808_v54, %v807_v53  ;;  %v1353_v56 = vpop.f32.mrb[24].mxu0 }
 0x319   : > { %v781_v45 = vadd.f32 %v1353_v56, %v1173_v31  ;;  %v772_v61 = vpop.f32.mrb[25].mxu0 }
 0x31a   : > { %v773_v62 = vadd.f32 %v1173_v31, %v772_v61  ;;  %v1354_v0 = vpop.f32.mrb[26].mxu0  ;;  %1379 = vmatprep.mubr.bf16.mxu1 %v821_v55 }
 0x31b   : > { %v784_v1 = vadd.f32 %v1354_v0, %v1173_v31  ;;  %v775_v30 = vpop.f32.mrb[27].mxu0  ;;  %1380 = vmatmul.mubr.bf16.gmra.mrb[20].mxu1 %v822_v23  ;;  %v813_v25 = vmax.f32 %v781_v45, 0.0 }
 0x31c   : > { %v776_v2 = vadd.f32 %v1173_v31, %v775_v30  ;;  %v811_v3 = vmax.f32 %v773_v62, 0.0 }
 0x31d   : > { %v814_v26 = vmax.f32 %v784_v1, 0.0 }
 0x31e   : > { %v812_v6 = vmax.f32 %v776_v2, 0.0 }
 0x31f   : > { %v824_v29 = vpack.c.bf16 %v814_v26, %v813_v25 }
 0x320   : > { %v823_v7 = vpack.c.bf16 %v812_v6, %v811_v3  ;;  %v1357_v8 = vpop.f32.mrb[28].mxu0 }
 0x321   : > { %v797_v63 = vadd.f32 %v1357_v8, %v1173_v31  ;;  %v788_v13 = vpop.f32.mrb[29].mxu0 }
 0x322   : > { %v789_v21 = vadd.f32 %v1173_v31, %v788_v13  ;;  %v1358_v36 = vpop.f32.mrb[30].mxu0  ;;  %1383 = vmatprep.mubr.bf16.mxu1 %v823_v7 }
 0x323   : > { %v800_v32 = vadd.f32 %v1358_v36, %v1173_v31  ;;  %v791_v35 = vpop.f32.mrb[31].mxu0  ;;  %1384 = vmatmul.mubr.bf16.gmra.mrb[24].mxu1 %v824_v29  ;;  %v817_v28 = vmax.f32 %v797_v63, 0.0 }
 0x324   : > { %v792_v27 = vadd.f32 %v1173_v31, %v791_v35  ;;  %v815_v34 = vmax.f32 %v789_v21, 0.0 }
 0x325   : > { %v818_v33 = vmax.f32 %v800_v32, 0.0 }
 0x326   : > { %v816_v17 = vmax.f32 %v792_v27, 0.0 }
 0x327   : > { %v826_v4 = vpack.c.bf16 %v818_v33, %v817_v28 }
 0x328   : > { %v825_v37 = vpack.c.bf16 %v816_v17, %v815_v34 }
 0x32a   : > { %1387 = vmatprep.mubr.bf16.mxu1 %v825_v37 }
 0x32b   : > { %1388 = vmatmul.mubr.bf16.gmra.mrb[28].mxu1 %v826_v4 }
 0x3e6   : > { %v1377_v38 = vpop.f32.mrb[16].mxu1 }
 0x3e7   : > { %v943_v39 = vadd.f32 %v1377_v38, %v1958_v5  ;;  %v934_v16 = vpop.f32.mrb[17].mxu1 }
 0x3e8   : > { %v935_v31 = vadd.f32 %v1958_v5, %v934_v16  ;;  %v1378_v40 = vpop.f32.mrb[18].mxu1 }
 0x3e9   : > { %v999_v41 = vmax.f32 %v943_v39, 0.0  ;;  %v946_v46 = vadd.f32 %v1378_v40, %v1958_v5  ;;  %v937_v48 = vpop.f32.mrb[19].mxu1 }
 0x3ea   : > { %v997_v49 = vmax.f32 %v935_v31, 0.0  ;;  %v938_v50 = vadd.f32 %v1958_v5, %v937_v48 }
 0x3eb   : > { %v1015_v51 = vadd.f32 %v999_v41, %v1886_v22  ;;  %v1000_v24 = vmax.f32 %v946_v46, 0.0 }
 0x3ec   : > { %v1013_v52 = vadd.f32 %v997_v49, %v1880_v15  ;;  %v998_v18 = vmax.f32 %v938_v50, 0.0 }
 0x3ed   : > { %1031 = vst [vmem:[%s1968_s27 + $0x10] sm:$0xff] %v1015_v51  ;;  %v1016_v19 = vadd.f32 %v1000_v24, %v1877_v14 }
 0x3ee   : > { %1029 = vst [vmem:[%s1968_s27] sm:$0xff] %v1013_v52  ;;  %v1014_v53 = vadd.f32 %v998_v18, %v1883_v20  ;;  %v1381_v54 = vpop.f32.mrb[20].mxu1 }
 0x3ef   : > { %1032 = vst [vmem:[%s1968_s27 + $0x18] sm:$0xff] %v1016_v19  ;;  %v959_v22 = vadd.f32 %v1381_v54, %v1958_v5  ;;  %v950_v15 = vpop.f32.mrb[21].mxu1 }
 0x3f0   : > { %1030 = vst [vmem:[%s1968_s27 + $0x8] sm:$0xff] %v1014_v53  ;;  %v951_v23 = vadd.f32 %v1958_v5, %v950_v15  ;;  %v1382_v55 = vpop.f32.mrb[22].mxu1 }
 0x3f1   : > { %v1003_v56 = vmax.f32 %v959_v22, 0.0  ;;  %v962_v45 = vadd.f32 %v1382_v55, %v1958_v5  ;;  %v953_v14 = vpop.f32.mrb[23].mxu1 }
 0x3f2   : > { %v1001_v61 = vmax.f32 %v951_v23, 0.0  ;;  %v954_v20 = vadd.f32 %v1958_v5, %v953_v14 }
 0x3f3   : > { %v1019_v62 = vadd.f32 %v1003_v56, %v1906_v47  ;;  %v1004_v0 = vmax.f32 %v962_v45, 0.0 }
 0x3f4   : > { %v1017_v1 = vadd.f32 %v1001_v61, %v1900_v43  ;;  %v1002_v30 = vmax.f32 %v954_v20, 0.0 }
 0x3f5   : > { %1035 = vst [vmem:[%s1968_s27 + $0x30] sm:$0xff] %v1019_v62  ;;  %v1020_v2 = vadd.f32 %v1004_v0, %v1897_v42 }
 0x3f6   : > { %1033 = vst [vmem:[%s1968_s27 + $0x20] sm:$0xff] %v1017_v1  ;;  %v1018_v25 = vadd.f32 %v1002_v30, %v1903_v44  ;;  %v1385_v26 = vpop.f32.mrb[24].mxu1 }
 0x3f7   : > { %1036 = vst [vmem:[%s1968_s27 + $0x38] sm:$0xff] %v1020_v2  ;;  %v975_v3 = vadd.f32 %v1385_v26, %v1958_v5  ;;  %v966_v6 = vpop.f32.mrb[25].mxu1 }
 0x3f8   : > { %1034 = vst [vmem:[%s1968_s27 + $0x28] sm:$0xff] %v1018_v25  ;;  %v967_v47 = vadd.f32 %v1958_v5, %v966_v6  ;;  %v1386_v29 = vpop.f32.mrb[26].mxu1 }
 0x3f9   : > { %v1007_v43 = vmax.f32 %v975_v3, 0.0  ;;  %v978_v7 = vadd.f32 %v1386_v29, %v1958_v5  ;;  %v969_v42 = vpop.f32.mrb[27].mxu1 }
 0x3fa   : > { %v1005_v8 = vmax.f32 %v967_v47, 0.0  ;;  %v970_v44 = vadd.f32 %v1958_v5, %v969_v42 }
 0x3fb   : > { %v1023_v63 = vadd.f32 %v1007_v43, %v1926_v60  ;;  %v1008_v13 = vmax.f32 %v978_v7, 0.0 }
 0x3fc   : > { %v1021_v21 = vadd.f32 %v1005_v8, %v1920_v58  ;;  %v1006_v36 = vmax.f32 %v970_v44, 0.0 }
 0x3fd   : > { %1039 = vst [vmem:[%s1968_s27 + $0x50] sm:$0xff] %v1023_v63  ;;  %v1024_v32 = vadd.f32 %v1008_v13, %v1917_v57 }
 0x3fe   : > { %1037 = vst [vmem:[%s1968_s27 + $0x40] sm:$0xff] %v1021_v21  ;;  %v1022_v35 = vadd.f32 %v1006_v36, %v1923_v59  ;;  %v1389_v27 = vpop.f32.mrb[28].mxu1 }
 0x3ff   : > { %1040 = vst [vmem:[%s1968_s27 + $0x58] sm:$0xff] %v1024_v32  ;;  %v991_v28 = vadd.f32 %v1389_v27, %v1958_v5  ;;  %v982_v33 = vpop.f32.mrb[29].mxu1 }
 0x400   : > { %1038 = vst [vmem:[%s1968_s27 + $0x48] sm:$0xff] %v1022_v35  ;;  %v983_v60 = vadd.f32 %v1958_v5, %v982_v33  ;;  %v1390_v34 = vpop.f32.mrb[30].mxu1 }
 0x401   : > { %v1011_v58 = vmax.f32 %v991_v28, 0.0  ;;  %v994_v17 = vadd.f32 %v1390_v34, %v1958_v5  ;;  %v985_v57 = vpop.f32.mrb[31].mxu1 }
 0x402   : > { %v1009_v4 = vmax.f32 %v983_v60, 0.0  ;;  %v986_v59 = vadd.f32 %v1958_v5, %v985_v57 }
 0x403   : > { %v1027_v37 = vadd.f32 %v1011_v58, %v1946_v12  ;;  %v1012_v38 = vmax.f32 %v994_v17, 0.0 }
 0x404   : > { %v1025_v39 = vadd.f32 %v1009_v4, %v1940_v10  ;;  %v1010_v16 = vmax.f32 %v986_v59, 0.0 }
 0x405   : > { %1043 = vst [vmem:[%s1968_s27 + $0x70] sm:$0xff] %v1027_v37  ;;  %v1028_v31 = vadd.f32 %v1012_v38, %v1937_v9 }
 0x406   : > { %1041 = vst [vmem:[%s1968_s27 + $0x60] sm:$0xff] %v1025_v39  ;;  %v1026_v12 = vadd.f32 %v1010_v16, %v1943_v11 }
 0x407   : > { %1044 = vst [vmem:[%s1968_s27 + $0x78] sm:$0xff] %v1028_v31 }
 0x408   : > { %1042 = vst [vmem:[%s1968_s27 + $0x68] sm:$0xff] %v1026_v12 }
 0x409   : > { %1557 = shalt.err (!%p1554_p7)
}
 0x40a   : > { %s1558_s20 = scalar_lea.hbm %s2013_s22, 2048  ;;  %s1562_s26 = scalar_lea.hbm %s2066_s3, 4096 }
 0x40b   : > { %p1559_p9 = scmp.ne.s32.totalorder %s2013_s22, %s1558_s20  ;;  %p1563_p5 = scmp.lt.u32.totalorder %s2013_s22, %s2066_s3 }
 0x40c   : > { %p1564_p11 = scmp.lt.u32.totalorder %s1562_s26, %s1558_s20  ;;  %p1566_p4 = scmp.lt.u32.totalorder %s1558_s20, %s2013_s22 }
 0x40d   : > { %p1560_p2 = pnand %p1559_p9, %p1736_p12 }
 0x40e   : > { %p1565_p1 = por %p1564_p11, %p1563_p5 }
 0x40f   : > { %p1561_p0 = pneg %p1560_p2 }
 0x410   : > { %p1567_p6 = por %p1566_p4, %p1565_p1 }
 0x412   : > { %p1568_p8 = pnand %p1567_p6, %p1561_p0 }
 0x414   : > { %1571 = shalt.err (!%p1568_p8)
}
 0x415   : > { %s1623_s11 = smov 128   ;;  %s1624_s27 = smov 8  }
 0x416   : > { %1397 = dma.vmem_to_hbm [thread:$0]  (%p1736_p12), %s2015_s29, 2048, %s2013_s22, %s1046_s16, %s1623_s11, %s1623_s11, %s1624_s27  }
 0x417 PF: > { %s1074_s28 = sand.u32 1, %s1602_s12   ;;  %p2081_p10 = scmp.ne.s32.totalorder %s2071_s19, 0 }
 0x418   : > { %p2082_p13 = scmp.ge.s32.totalorder %s1614_s15, 2  ;;  %s1075_s23 = scalar_lea.sflag [#allocation4], %s1074_s28 }
 0x41a   : > { %p1408_p3 = pnand %p2082_p13, %p2081_p10 }
 0x41c   : > { %1597 = dma.done.wait (!%p1408_p3), %s1075_s23, 2048  }
 0x41d   : > { %1599 = vsyncadd (!%p1408_p3), %s1075_s23, 4294965248  ;;  %p17_p7 = scmp.ge.s32.totalorder %s1701_s24, 4   ;;  %s2083_s12 = smov %s1606_s13 }
 0x41e   : > { %s2084_s13 = smov %s1610_s14  ;;  %s2085_s14 = smov %s1732_s17 }
 0x41f   : > { %s2086_s15 = smov %s1701_s24  ;;  %19 = sbr.rel (!%p17_p7) target bundleno = 6 (0x6), region = 87 }
 0x426   :  { %1080 = vsyncpa [#allocation3], 1 }
 0x427   :  { %1082 = vsyncpa [#allocation3 + $0x1], 1 }
 0x428   :  { %1083 = vsyncpa [#allocation6], 1 }
 0x429   :  { %1084 = vsyncpa [#allocation4], 1 }
 0x42a   :  { %1086 = vsyncpa [#allocation4 + $0x1], 1 }

</bundles_post_ra>
